<compile_context>
chip_gen: v5e
topology: v5e:2x2
jax: 0.10.0
libtpu: 0.0.40
codegen_flags: <defaults>
</compile_context>

<pallas_src>
import jax
import jax.numpy as jnp
from jax.experimental import pallas as pl
from jax.experimental.pallas import tpu as pltpu

# ----- small synthetic shapes consistent with the module -----
BATCH = 4
ST_DIM = 384      # config.sentence_transformer_hidden_dim (e.g. MiniLM-L6 -> 384)
HIDDEN = 128      # config.n_hidden_block
N_TOPICS = 16     # config.n_topics

_SUBLANE = 8
_LANE = 128
_MAX_BATCH_TILE = 256


def _softplus(v):
    # numerically-stable softplus, matches torch.nn.functional.softplus
    return jnp.maximum(v, 0.0) + jnp.log1p(jnp.exp(-jnp.abs(v)))


def encoder_kernel(x_ref, w1_ref, b1_ref, wh_ref, bh_ref, out_ref):
    # linear_layer -> softplus -> fused (mean_fc | logvar_fc) head, one lane-dense store.
    h = jnp.dot(x_ref[...], w1_ref[...], preferred_element_type=jnp.float32) + b1_ref[...]
    h = _softplus(h)
    out_ref[...] = (
        jnp.dot(h, wh_ref[...], preferred_element_type=jnp.float32) + bh_ref[...]
    )


def encoder_forward(x, w1, b1, w_head, b_head):
    """x:[B,D], w1:[D,H], b1:[H], w_head:[H,2K], b_head:[2K] -> (mean[B,K], logvar[B,K])."""
    B, D = x.shape
    H = w1.shape[1]
    K2 = w_head.shape[1]
    K = K2 // 2

    # --- layout padding (review: sublane-full batch, lane-dense 128-multiple output) ---
    if B <= _MAX_BATCH_TILE:
        Bp = max(_SUBLANE, ((B + _SUBLANE - 1) // _SUBLANE) * _SUBLANE)
        TB = Bp
    else:
        TB = _MAX_BATCH_TILE
        Bp = ((B + TB - 1) // TB) * TB
    Np = ((K2 + _LANE - 1) // _LANE) * _LANE

    x_p = jnp.zeros((Bp, D), jnp.float32).at[:B].set(x)
    b1_2d = b1.reshape(1, H).astype(jnp.float32)
    wh_p = jnp.zeros((H, Np), jnp.float32).at[:, :K2].set(w_head)
    bh_p = jnp.zeros((1, Np), jnp.float32).at[:, :K2].set(b_head.reshape(1, K2))

    out = pl.pallas_call(
        encoder_kernel,
        out_shape=jax.ShapeDtypeStruct((Bp, Np), jnp.float32),
        grid=(Bp // TB,),
        in_specs=[
            pl.BlockSpec((TB, D), lambda i: (i, 0)),
            pl.BlockSpec((D, H), lambda i: (0, 0)),
            pl.BlockSpec((1, H), lambda i: (0, 0)),
            pl.BlockSpec((H, Np), lambda i: (0, 0)),
            pl.BlockSpec((1, Np), lambda i: (0, 0)),
        ],
        out_specs=pl.BlockSpec((TB, Np), lambda i: (i, 0)),
        compiler_params=pltpu.CompilerParams(
            dimension_semantics=("parallel",)),
    )(x_p, w1.astype(jnp.float32), b1_2d, wh_p, bh_p)

    y = out[:B, :K2]
    return y[:, :K], y[:, K:]


# ----------------------------- pure-JAX reference -----------------------------
def reference_forward(x, w1, b1, w_head, b_head):
    hp = jax.lax.Precision.HIGHEST
    h = jax.nn.softplus(jnp.dot(x, w1, precision=hp) + b1)
    y = jnp.dot(h, w_head, precision=hp) + b_head
    K = w_head.shape[1] // 2
    return y[:, :K], y[:, K:]


if __name__ == "__main__":
    key = jax.random.PRNGKey(0)
    kx, k1, kb1, km, kl, kbm, kbl = jax.random.split(key, 7)
    f32 = jnp.float32

    # precomputed sentence-transformer embeddings for a small batch of documents
    x = jax.random.normal(kx, (BATCH, ST_DIM), f32)

    # nn.Linear weights, stored as [in_features, out_features] (x @ W + b)
    w1 = jax.random.normal(k1, (ST_DIM, HIDDEN), f32) * 0.05
    b1 = jax.random.normal(kb1, (HIDDEN,), f32) * 0.05
    wm = jax.random.normal(km, (HIDDEN, N_TOPICS), f32) * 0.05
    wl = jax.random.normal(kl, (HIDDEN, N_TOPICS), f32) * 0.05
    bm = jax.random.normal(kbm, (N_TOPICS,), f32) * 0.05
    bl = jax.random.normal(kbl, (N_TOPICS,), f32) * 0.05

    # fuse the two heads (mean_fc | logvar_fc) into a single matmul weight
    w_head = jnp.concatenate([wm, wl], axis=1)   # (HIDDEN, 2*N_TOPICS)
    b_head = jnp.concatenate([bm, bl], axis=0)   # (2*N_TOPICS,)

    fwd = jax.jit(encoder_forward)
    mean, logvar = jax.block_until_ready(fwd(x, w1, b1, w_head, b_head))

    ref_mean, ref_logvar = reference_forward(x, w1, b1, w_head, b_head)
    assert mean.shape == (BATCH, N_TOPICS), mean.shape
    assert logvar.shape == (BATCH, N_TOPICS), logvar.shape
    assert bool(jnp.all(jnp.isfinite(mean))) and bool(jnp.all(jnp.isfinite(logvar)))
    assert bool(jnp.allclose(mean, ref_mean, rtol=1e-3, atol=1e-3))
    assert bool(jnp.allclose(logvar, ref_logvar, rtol=1e-3, atol=1e-3))

    print("KERNEL_OK")
</pallas_src>

<mosaic_0001>
module attributes {stable_mosaic.version = 11 : i64} {
  func.func @encoder_kernel(%arg0: i32, %arg1: memref<8x384xf32, #tpu.memory_space<vmem>>, %arg2: memref<384x128xf32, #tpu.memory_space<vmem>>, %arg3: memref<1x128xf32, #tpu.memory_space<vmem>>, %arg4: memref<128x128xf32, #tpu.memory_space<vmem>>, %arg5: memref<1x128xf32, #tpu.memory_space<vmem>>, %arg6: memref<8x128xf32, #tpu.memory_space<vmem>>) attributes {dimension_semantics = [#tpu.dimension_semantics<parallel>], iteration_bounds = array<i64: 1>, scalar_prefetch = 0 : i64, scratch_operands = 0 : i64, tpu.core_type = #tpu.core_type<tc>, window_params = [{transform_indices = @transform_0, window_bounds = array<i64: 8, 384>}, {pipeline_mode = #tpu.pipeline_mode<synchronous>, transform_indices = @transform_1, window_bounds = array<i64: 384, 128>}, {pipeline_mode = #tpu.pipeline_mode<synchronous>, transform_indices = @transform_2, window_bounds = array<i64: 1, 128>}, {pipeline_mode = #tpu.pipeline_mode<synchronous>, transform_indices = @transform_3, window_bounds = array<i64: 128, 128>}, {pipeline_mode = #tpu.pipeline_mode<synchronous>, transform_indices = @transform_4, window_bounds = array<i64: 1, 128>}, {transform_indices = @transform_5, window_bounds = array<i64: 8, 128>}]} {
    %c0 = arith.constant 0 : index
    %c0_0 = arith.constant 0 : index
    %0 = vector.load %arg1[%c0, %c0_0] : memref<8x384xf32, #tpu.memory_space<vmem>>, vector<8x384xf32>
    %c0_1 = arith.constant 0 : index
    %c0_2 = arith.constant 0 : index
    %1 = vector.load %arg2[%c0_1, %c0_2] : memref<384x128xf32, #tpu.memory_space<vmem>>, vector<384x128xf32>
    %cst = arith.constant dense<0.000000e+00> : vector<8x128xf32>
    %2 = tpu.matmul %0, %1, %cst {dimension_numbers = #tpu.dot_dimension_numbers<[1], [0], [0], [1], [0, 0, 1, 1], [], []>} : vector<8x384xf32>, vector<384x128xf32>, vector<8x128xf32> -> vector<8x128xf32>
    %c0_3 = arith.constant 0 : index
    %c0_4 = arith.constant 0 : index
    %3 = vector.load %arg3[%c0_3, %c0_4] : memref<1x128xf32, #tpu.memory_space<vmem>>, vector<1x128xf32>
    %4 = vector.broadcast %3 : vector<1x128xf32> to vector<8x128xf32>
    %5 = arith.addf %2, %4 : vector<8x128xf32>
    %cst_5 = arith.constant 0.000000e+00 : f32
    %6 = vector.broadcast %cst_5 : f32 to vector<8x128xf32>
    %7 = arith.maximumf %5, %6 : vector<8x128xf32>
    %8 = math.absf %5 : vector<8x128xf32>
    %cst_6 = arith.constant 0.000000e+00 : f32
    %9 = vector.broadcast %cst_6 : f32 to vector<8x128xf32>
    %10 = arith.subf %9, %8 : vector<8x128xf32>
    %11 = math.exp %10 : vector<8x128xf32>
    %12 = math.log1p %11 : vector<8x128xf32>
    %13 = arith.addf %7, %12 : vector<8x128xf32>
    %c0_7 = arith.constant 0 : index
    %c0_8 = arith.constant 0 : index
    %14 = vector.load %arg4[%c0_7, %c0_8] : memref<128x128xf32, #tpu.memory_space<vmem>>, vector<128x128xf32>
    %cst_9 = arith.constant dense<0.000000e+00> : vector<8x128xf32>
    %15 = tpu.matmul %13, %14, %cst_9 {dimension_numbers = #tpu.dot_dimension_numbers<[1], [0], [0], [1], [0, 0, 1, 1], [], []>} : vector<8x128xf32>, vector<128x128xf32>, vector<8x128xf32> -> vector<8x128xf32>
    %c0_10 = arith.constant 0 : index
    %c0_11 = arith.constant 0 : index
    %16 = vector.load %arg5[%c0_10, %c0_11] : memref<1x128xf32, #tpu.memory_space<vmem>>, vector<1x128xf32>
    %17 = vector.broadcast %16 : vector<1x128xf32> to vector<8x128xf32>
    %18 = arith.addf %15, %17 : vector<8x128xf32>
    %c0_12 = arith.constant 0 : index
    %c0_13 = arith.constant 0 : index
    %19 = vector.load %arg6[%c0_12, %c0_13] : memref<8x128xf32, #tpu.memory_space<vmem>>, vector<8x128xf32>
    tpu.vector_store %arg6[%c0_12, %c0_13], %18 {strides = array<i32>} : memref<8x128xf32, #tpu.memory_space<vmem>>, vector<8x128xf32>,
    return
  }
  func.func @transform_0(%arg0: i32) -> (i32, i32) {
    %c0_i32 = arith.constant 0 : i32
    %c0_i32_0 = arith.constant 0 : i32
    return %arg0, %c0_i32 : i32, i32
  }
  func.func @transform_1(%arg0: i32) -> (i32, i32) {
    %c0_i32 = arith.constant 0 : i32
    %c0_i32_0 = arith.constant 0 : i32
    %c0_i32_1 = arith.constant 0 : i32
    return %c0_i32, %c0_i32_0 : i32, i32
  }
  func.func @transform_2(%arg0: i32) -> (i32, i32) {
    %c0_i32 = arith.constant 0 : i32
    %c0_i32_0 = arith.constant 0 : i32
    %c0_i32_1 = arith.constant 0 : i32
    return %c0_i32, %c0_i32_0 : i32, i32
  }
  func.func @transform_3(%arg0: i32) -> (i32, i32) {
    %c0_i32 = arith.constant 0 : i32
    %c0_i32_0 = arith.constant 0 : i32
    %c0_i32_1 = arith.constant 0 : i32
    return %c0_i32, %c0_i32_0 : i32, i32
  }
  func.func @transform_4(%arg0: i32) -> (i32, i32) {
    %c0_i32 = arith.constant 0 : i32
    %c0_i32_0 = arith.constant 0 : i32
    %c0_i32_1 = arith.constant 0 : i32
    return %c0_i32, %c0_i32_0 : i32, i32
  }
  func.func @transform_5(%arg0: i32) -> (i32, i32) {
    %c0_i32 = arith.constant 0 : i32
    %c0_i32_0 = arith.constant 0 : i32
    return %arg0, %c0_i32 : i32, i32
  }
}

</mosaic_0001>

<bundles_post_ra>
// kernel: encoder_forward.1
= control target key start
LH: loop header
LB: loop body
LE: loop exit
PB: predicated region body
PF: predicated region fallthrough
CT: control target
= control target key end

     0   :  { %s441_s1 = inlined_call_operand.vmem [shape: f32[384,128], index: 1, kind: input, shape index: {}]   ;;  %s442_s2 = inlined_call_operand.vmem [shape: f32[1,128], index: 2, kind: input, shape index: {}]   ;;  %s443_s0 = inlined_call_operand.vmem [shape: f32[8,384], index: 0, kind: input, shape index: {}]   ;;  %s444_s4 = inlined_call_operand.vmem [shape: f32[1,128], index: 4, kind: input, shape index: {}]   ;;  %s445_s3 = inlined_call_operand.vmem [shape: f32[128,128], index: 3, kind: input, shape index: {}]   ;;  %s446_s5 = inlined_call_operand.vmem [shape: f32[8,128], index: 5, kind: output, shape index: {}]  }
   0x1   :  { %v70_v0 = vld [vmem:[%s441_s1 + $0x178] sm:$0xff]  ;;  %v69_v2 = vld [vmem:[%s441_s1 + $0x170] sm:$0xff]  ;;  %v68_v5 = vld [vmem:[%s441_s1 + $0x168] sm:$0xff] }
   0x2   :  { %v38_v1 = vld [vmem:[%s441_s1 + $0x78] sm:$0xff]  ;;  %115 = vmatpush.msra.mxu2 %v70_v0  ;;  %v37_v3 = vld [vmem:[%s441_s1 + $0x70] sm:$0xff]  ;;  %v36_v6 = vld [vmem:[%s441_s1 + $0x68] sm:$0xff] }
   0x3   :  { %75 = vmatpush.msra.mxu0 %v38_v1  ;;  %v54_v4 = vld [vmem:[%s441_s1 + $0xf8] sm:$0xff]  ;;  %v53_v7 = vld [vmem:[%s441_s1 + $0xf0] sm:$0xff]  ;;  %v52_v8 = vld [vmem:[%s441_s1 + $0xe8] sm:$0xff] }
   0x4   :  { %95 = vmatpush.msra.mxu1 %v54_v4  ;;  %116 = vmatpush.msra.mxu2 %v69_v2  ;;  %v67_v9 = vld [vmem:[%s441_s1 + $0x160] sm:$0xff]  ;;  %v66_v12 = vld [vmem:[%s441_s1 + $0x158] sm:$0xff]  ;;  %v65_v15 = vld [vmem:[%s441_s1 + $0x150] sm:$0xff] }
   0x5   :  { %76 = vmatpush.msra.mxu0 %v37_v3  ;;  %v35_v10 = vld [vmem:[%s441_s1 + $0x60] sm:$0xff]  ;;  %v34_v13 = vld [vmem:[%s441_s1 + $0x58] sm:$0xff]  ;;  %v33_v16 = vld [vmem:[%s441_s1 + $0x50] sm:$0xff] }
   0x6   :  { %96 = vmatpush.msra.mxu1 %v53_v7  ;;  %117 = vmatpush.msra.mxu2 %v68_v5  ;;  %v51_v11 = vld [vmem:[%s441_s1 + $0xe0] sm:$0xff]  ;;  %v50_v14 = vld [vmem:[%s441_s1 + $0xd8] sm:$0xff]  ;;  %v49_v17 = vld [vmem:[%s441_s1 + $0xd0] sm:$0xff] }
   0x7   :  { %77 = vmatpush.msra.mxu0 %v36_v6  ;;  %v64_v18 = vld [vmem:[%s441_s1 + $0x148] sm:$0xff]  ;;  %v63_v21 = vld [vmem:[%s441_s1 + $0x140] sm:$0xff]  ;;  %v62_v24 = vld [vmem:[%s441_s1 + $0x138] sm:$0xff] }
   0x8   :  { %97 = vmatpush.msra.mxu1 %v52_v8  ;;  %118 = vmatpush.msra.mxu2 %v67_v9  ;;  %v32_v19 = vld [vmem:[%s441_s1 + $0x48] sm:$0xff]  ;;  %v31_v22 = vld [vmem:[%s441_s1 + $0x40] sm:$0xff]  ;;  %v30_v25 = vld [vmem:[%s441_s1 + $0x38] sm:$0xff] }
   0x9   :  { %78 = vmatpush.msra.mxu0 %v35_v10  ;;  %v48_v20 = vld [vmem:[%s441_s1 + $0xc8] sm:$0xff]  ;;  %v47_v23 = vld [vmem:[%s441_s1 + $0xc0] sm:$0xff]  ;;  %v46_v26 = vld [vmem:[%s441_s1 + $0xb8] sm:$0xff] }
   0xa   :  { %98 = vmatpush.msra.mxu1 %v51_v11  ;;  %119 = vmatpush.msra.mxu2 %v66_v12  ;;  %v61_v27 = vld [vmem:[%s441_s1 + $0x130] sm:$0xff]  ;;  %v60_v30 = vld [vmem:[%s441_s1 + $0x128] sm:$0xff]  ;;  %v59_v33 = vld [vmem:[%s441_s1 + $0x120] sm:$0xff] }
   0xb   :  { %79 = vmatpush.msra.mxu0 %v34_v13  ;;  %v29_v28 = vld [vmem:[%s441_s1 + $0x30] sm:$0xff]  ;;  %v28_v31 = vld [vmem:[%s441_s1 + $0x28] sm:$0xff]  ;;  %v27_v34 = vld [vmem:[%s441_s1 + $0x20] sm:$0xff] }
   0xc   :  { %99 = vmatpush.msra.mxu1 %v50_v14  ;;  %120 = vmatpush.msra.mxu2 %v65_v15  ;;  %v45_v29 = vld [vmem:[%s441_s1 + $0xb0] sm:$0xff]  ;;  %v44_v32 = vld [vmem:[%s441_s1 + $0xa8] sm:$0xff]  ;;  %v43_v35 = vld [vmem:[%s441_s1 + $0xa0] sm:$0xff] }
   0xd   :  { %80 = vmatpush.msra.mxu0 %v33_v16  ;;  %v58_v36 = vld [vmem:[%s441_s1 + $0x118] sm:$0xff]  ;;  %v57_v39 = vld [vmem:[%s441_s1 + $0x110] sm:$0xff]  ;;  %v56_v42 = vld [vmem:[%s441_s1 + $0x108] sm:$0xff] }
   0xe   :  { %100 = vmatpush.msra.mxu1 %v49_v17  ;;  %121 = vmatpush.msra.mxu2 %v64_v18  ;;  %v26_v37 = vld [vmem:[%s441_s1 + $0x18] sm:$0xff]  ;;  %v25_v40 = vld [vmem:[%s441_s1 + $0x10] sm:$0xff]  ;;  %v24_v43 = vld [vmem:[%s441_s1 + $0x8] sm:$0xff] }
   0xf   :  { %81 = vmatpush.msra.mxu0 %v32_v19  ;;  %v42_v38 = vld [vmem:[%s441_s1 + $0x98] sm:$0xff]  ;;  %v41_v41 = vld [vmem:[%s441_s1 + $0x90] sm:$0xff]  ;;  %v40_v44 = vld [vmem:[%s441_s1 + $0x88] sm:$0xff] }
  0x10   :  { %101 = vmatpush.msra.mxu1 %v48_v20  ;;  %122 = vmatpush.msra.mxu2 %v63_v21  ;;  %v55_v45 = vld [vmem:[%s441_s1 + $0x100] sm:$0xff]  ;;  %v22_v47 = vld [vmem:[%s443_s0 + $0x10] sm:$0xff]  ;;  %v21_v50 = vld [vmem:[%s443_s0 + $0x8] sm:$0xff] }
  0x11   :  { %82 = vmatpush.msra.mxu0 %v31_v22  ;;  %v23_v46 = vld [vmem:[%s441_s1] sm:$0xff]  ;;  %v165_v51 = vld [vmem:[%s445_s3 + $0x78] sm:$0xff]  ;;  %v164_v52 = vld [vmem:[%s445_s3 + $0x70] sm:$0xff] }
  0x12   :  { %102 = vmatpush.msra.mxu1 %v47_v23  ;;  %123 = vmatpush.msra.mxu2 %v62_v24  ;;  %v20_v48 = vld [vmem:[%s443_s0] sm:$0xff]  ;;  %v163_v53 = vld [vmem:[%s445_s3 + $0x68] sm:$0xff]  ;;  %v161_v55 = vld [vmem:[%s445_s3 + $0x58] sm:$0xff] }
  0x13   :  { %83 = vmatpush.msra.mxu0 %v30_v25  ;;  %v39_v49 = vld [vmem:[%s441_s1 + $0x80] sm:$0xff]  ;;  %170 = vmatpush.msra.mxu3 %v165_v51  ;;  %v160_v56 = vld [vmem:[%s445_s3 + $0x50] sm:$0xff]  ;;  %v159_v57 = vld [vmem:[%s445_s3 + $0x48] sm:$0xff] }
  0x14   :  { %103 = vmatpush.msra.mxu1 %v46_v26  ;;  %124 = vmatpush.msra.mxu2 %v61_v27  ;;  %v162_v54 = vld [vmem:[%s445_s3 + $0x60] sm:$0xff]  ;;  %v157_v59 = vld [vmem:[%s445_s3 + $0x38] sm:$0xff]  ;;  %v156_v60 = vld [vmem:[%s445_s3 + $0x30] sm:$0xff] }
  0x15   :  { %84 = vmatpush.msra.mxu0 %v29_v28  ;;  %171 = vmatpush.msra.mxu3 %v164_v52  ;;  %v158_v58 = vld [vmem:[%s445_s3 + $0x40] sm:$0xff]  ;;  %v155_v61 = vld [vmem:[%s445_s3 + $0x28] sm:$0xff]  ;;  %v153_v63 = vld [vmem:[%s445_s3 + $0x18] sm:$0xff] }
  0x16   :  { %104 = vmatpush.msra.mxu1 %v45_v29  ;;  %125 = vmatpush.msra.mxu2 %v60_v30  ;;  %v154_v62 = vld [vmem:[%s445_s3 + $0x20] sm:$0xff]  ;;  %v152_v0 = vld [vmem:[%s445_s3 + $0x10] sm:$0xff]  ;;  %v151_v2 = vld [vmem:[%s445_s3 + $0x8] sm:$0xff] }
  0x17   :  { %85 = vmatpush.msra.mxu0 %v28_v31  ;;  %172 = vmatpush.msra.mxu3 %v163_v53  ;;  %v195_v1 = vld [vmem:[%s442_s2] ss:$0 sm:$0xff] }
  0x18   :  { %105 = vmatpush.msra.mxu1 %v44_v32  ;;  %126 = vmatpush.msra.mxu2 %v59_v33  ;;  %v150_v4 = vld [vmem:[%s445_s3] sm:$0xff] }
  0x19   :  { %86 = vmatpush.msra.mxu0 %v27_v34  ;;  %173 = vmatpush.msra.mxu3 %v162_v54  ;;  %v196_v24 = vld [vmem:[%s444_s4] ss:$0 sm:$0xff] }
  0x1a   :  { %106 = vmatpush.msra.mxu1 %v43_v35  ;;  %127 = vmatpush.msra.mxu2 %v58_v36 }
  0x1b   :  { %87 = vmatpush.msra.mxu0 %v26_v37  ;;  %174 = vmatpush.msra.mxu3 %v161_v55 }
  0x1c   :  { %107 = vmatpush.msra.mxu1 %v42_v38  ;;  %128 = vmatpush.msra.mxu2 %v57_v39 }
  0x1d   :  { %88 = vmatpush.msra.mxu0 %v25_v40  ;;  %175 = vmatpush.msra.mxu3 %v160_v56 }
  0x1e   :  { %108 = vmatpush.msra.mxu1 %v41_v41  ;;  %129 = vmatpush.msra.mxu2 %v56_v42 }
  0x1f   :  { %89 = vmatpush.msra.mxu0 %v24_v43  ;;  %176 = vmatpush.msra.mxu3 %v159_v57 }
  0x20   :  { %109 = vmatpush.msra.mxu1 %v40_v44  ;;  %130 = vmatpush.msra.mxu2 %v55_v45 }
  0x21   :  { %90 = vmatpush.msra.mxu0 %v23_v46  ;;  %131 = vmatmul.f32.vlgmr.msra.gmra.mxu2 %v22_v47 }
  0x22   :  { %91 = vmatmul.f32.vlgmr.msra.gmra.mxu0 %v20_v48  ;;  %110 = vmatpush.msra.mxu1 %v39_v49 }
  0x23   :  { %111 = vmatmul.f32.vlgmr.msra.gmra.mxu1 %v21_v50  ;;  %177 = vmatpush.msra.mxu3 %v158_v58 }
  0x25   :  { %178 = vmatpush.msra.mxu3 %v157_v59 }
  0x27   :  { %179 = vmatpush.msra.mxu3 %v156_v60 }
  0x29   :  { %180 = vmatpush.msra.mxu3 %v155_v61 }
  0x2b   :  { %181 = vmatpush.msra.mxu3 %v154_v62 }
  0x2d   :  { %182 = vmatpush.msra.mxu3 %v153_v63 }
  0x2f   :  { %183 = vmatpush.msra.mxu3 %v152_v0 }
  0x31   :  { %184 = vmatpush.msra.mxu3 %v151_v2 }
  0x33   :  { %185 = vmatpush.msra.mxu3 %v150_v4 }
  0x9f   :  { %v92_v3 = vpop.f32.mrf.mxu0 }
  0xa0   :  { %v93_v5 = vadd.f32 %v195_v1, %v92_v3  ;;  %v112_v6 = vpop.f32.mrf.mxu1 }
  0xa2   :  { %v113_v7 = vadd.f32 %v112_v6, %v93_v5 }
  0xa4   :  { %v132_v8 = vpop.f32.mrf.mxu2 }
  0xa5   :  { %v133_v9 = vadd.f32 %v132_v8, %v113_v7 }
  0xa7   :  { %v136_v10 = vand.u32 2147483647, %v133_v9  ;;  %v135_v21 = vmax.f32 %v133_v9, 0.0 }
  0xa9   :  { %v137_v11 = vsub.f32 0.0, %v136_v10 }
  0xab   :  { %v138_v12 = vmul.f32 1.442695, %v137_v11 }
  0xad   :  { %197 = vpow2.f32 %v138_v12 }
  0xb3   :  { %v198_v13 = vpop.eup %197 }
  0xb4   :  { %v140_v14 = vadd.f32 1.0, %v198_v13  ;;  %v143_v15 = vmul.f32 -0.5, %v198_v13  ;;  %v146_v17 = vand.u32 2147483647, %v198_v13 }
  0xb6   :  { %199 = vlog2.f32 %v140_v14  ;;  %v144_v16 = vadd.f32 1.0, %v143_v15  ;;  %vm147_vm0 = vcmp.lt.f32.partialorder %v146_v17, 0.0004427343 }
  0xb8   :  { %v145_v20 = vmul.f32 %v198_v13, %v144_v16 }
  0xbc   :  { %v200_v18 = vpop.eup %199 }
  0xbd   :  { %v142_v19 = vmul.f32 0.6931472, %v200_v18 }
  0xbf   :  { %v148_v22 = vsel %vm147_vm0, %v145_v20, %v142_v19 }
  0xc0   :  { %v149_v23 = vadd.f32 %v148_v22, %v135_v21 }
  0xc2   :  { %186 = vmatmul.f32.vlgmr.msra.gmra.mxu3 %v149_v23 }
 0x145   :  { %v187_v25 = vpop.f32.mrf.mxu3 }
 0x146   :  { %v188_v26 = vadd.f32 %v196_v24, %v187_v25 }
 0x148   :  { %190 = vst [vmem:[%s446_s5] sm:$0xff] %v188_v26 }

</bundles_post_ra>
